<compile_context>
chip_gen: v6e
topology: v6e:2x2x1
jax: 0.10.0
libtpu: 0.0.40
codegen_flags: <defaults>
</compile_context>

<pallas_src>
import functools

import jax
import jax.numpy as jnp
from jax.experimental import pallas as pl
from jax.experimental.pallas import tpu as pltpu

_MIB = 1024 * 1024


def _round_up(x, m):
    return ((x + m - 1) // m) * m


def _tpu_generation():
    """Best-effort TPU generation tag: 'v5e', 'v6e', 'v7x', or ''."""
    try:
        kind = jax.devices()[0].device_kind.lower()
    except Exception:
        return ""
    if "v7" in kind or "7x" in kind:
        return "v7x"
    if "v6" in kind:
        return "v6e"
    if "v5" in kind:
        return "v5e"
    return ""


def _vmem_capacity_bytes(gen):
    """Physical VMEM per TensorCore (queried when possible, per-gen fallback)."""
    try:
        cap = int(pltpu.get_tpu_info().vmem_capacity_bytes)
        if cap > 0:
            return cap
    except Exception:
        pass
    return 64 * _MIB if gen == "v7x" else 128 * _MIB


def _default_tiles(gen):
    """(block_rows, dff_chunk, mxu_align) defaults per generation."""
    if gen == "v7x":
        return 512, 512, 256       # 64 MiB VMEM: smaller tiles, still MXU-aligned
    if gen == "v6e":
        return 1024, 1024, 256     # 128 MiB VMEM, 2x256x256 MXU
    if gen == "v5e":
        return 1024, 1024, 128     # HBM-BW bound: biggest row tile, 4x128x128 MXU
    return 512, 512, 128           # unknown: conservative


def _sublane_multiple(dtype):
    """Row alignment for packed sublanes: 8 (f32), 16 (bf16), 32 (int8/fp8)."""
    return max(8, 32 // jnp.dtype(dtype).itemsize)


def _pick_dff_chunk(d_ff, target, align):
    """Largest multiple of `align` <= target that evenly divides d_ff, else full d_ff."""
    if d_ff <= target or d_ff % align != 0:
        return d_ff
    c = (min(target, d_ff) // align) * align
    while c >= align:
        if d_ff % c == 0:
            return c
        c -= align
    return d_ff


def _ffn_kernel_acc(x_ref, w1_ref, b1_ref, w2_ref, b2_ref, o_ref, acc_ref):
    """Multi-chunk path: accumulate partial products over d_ff chunks in f32 VMEM."""
    k = pl.program_id(1)

    @pl.when(k == 0)
    def _init():
        acc_ref[...] = jnp.zeros_like(acc_ref)

    # Hidden chunk: x @ W1[:, chunk] + b1[chunk] -> ReLU, in f32 on the MXU/VPU.
    h = jnp.dot(x_ref[...], w1_ref[...], preferred_element_type=jnp.float32)
    h = jnp.maximum(h + b1_ref[...].astype(jnp.float32), 0.0)
    # TODO(synk): training-mode dropout (PRNG mask) omitted; eval-mode dropout == identity.

    acc_ref[...] += jnp.dot(h.astype(w2_ref.dtype), w2_ref[...],
                            preferred_element_type=jnp.float32)

    @pl.when(k == pl.num_programs(1) - 1)
    def _finalize():
        o_ref[...] = (acc_ref[...] + b2_ref[...].astype(jnp.float32)).astype(o_ref.dtype)


def _ffn_kernel_fused(x_ref, w1_ref, b1_ref, w2_ref, b2_ref, o_ref):
    """Single-chunk path: no accumulator scratch, write the output tile directly."""
    h = jnp.dot(x_ref[...], w1_ref[...], preferred_element_type=jnp.float32)
    h = jnp.maximum(h + b1_ref[...].astype(jnp.float32), 0.0)
    # TODO(synk): training-mode dropout (PRNG mask) omitted; eval-mode dropout == identity.
    out = jnp.dot(h.astype(w2_ref.dtype), w2_ref[...],
                  preferred_element_type=jnp.float32)
    o_ref[...] = (out + b2_ref[...].astype(jnp.float32)).astype(o_ref.dtype)


@functools.partial(jax.jit,
                   static_argnames=("bm", "bff", "vmem_limit", "resident_weights"))
def _feed_forward_impl(x, w1, b1, w2, b2, *, bm, bff, vmem_limit, resident_weights):
    n, d_model = x.shape
    d_ff = w1.shape[1]

    n_pad = _round_up(n, bm)
    if n_pad != n:
        x = jnp.pad(x, ((0, n_pad - n), (0, 0)))

    n_k = d_ff // bff
    grid = (n_pad // bm, n_k)

    def _wspec(shape, index_map):
        # Constant-index weight blocks: single-buffer them (DMA'd once, resident).
        if resident_weights:
            try:
                return pl.BlockSpec(shape, index_map, pipeline_mode=pl.Buffered(1))
            except TypeError:
                pass  # older jax without pipeline_mode: fall back to default buffering
        return pl.BlockSpec(shape, index_map)

    in_specs = [
        pl.BlockSpec((bm, d_model), lambda i, k: (i, 0)),   # x row tile
        _wspec((d_model, bff), lambda i, k: (0, k)),        # W1 chunk
        _wspec((1, bff), lambda i, k: (0, k)),              # b1 chunk
        _wspec((bff, d_model), lambda i, k: (k, 0)),        # W2 chunk
        _wspec((1, d_model), lambda i, k: (0, 0)),          # b2 (resident)
    ]
    out_spec = pl.BlockSpec((bm, d_model), lambda i, k: (i, 0))

    if n_k == 1:
        kernel = _ffn_kernel_fused
        scratch = []
    else:
        kernel = _ffn_kernel_acc
        scratch = [pltpu.VMEM((bm, d_model), jnp.float32)]

    out = pl.pallas_call(
        kernel,
        out_shape=jax.ShapeDtypeStruct((n_pad, d_model), x.dtype),
        grid_spec=pltpu.PrefetchScalarGridSpec(
            num_scalar_prefetch=0,
            grid=grid,
            in_specs=in_specs,
            out_specs=out_spec,
            scratch_shapes=scratch,
        ),
        compiler_params=pltpu.CompilerParams(
            dimension_semantics=("parallel", "arbitrary"),
            vmem_limit_bytes=vmem_limit,
        ),
    )(x, w1, b1, w2, b2)

    return out[:n] if n_pad != n else out


def feed_forward(x, w1, b1, w2, b2, *, block_rows=None, dff_chunk=None):
    """relu(x @ w1 + b1) @ w2 + b2 (dropout in eval mode == identity).

    x: [N, d_model]; w1: [d_model, d_ff]; b1: [1, d_ff];
    w2: [d_ff, d_model]; b2: [1, d_model]  ->  [N, d_model].
    For best MXU throughput on v6e/v7x pass bf16 x / weights (f32 accumulation is
    always used inside the kernel).
    """
    n, d_model = x.shape
    d_ff = w1.shape[1]

    gen = _tpu_generation()
    def_rows, def_dff, mxu_align = _default_tiles(gen)
    block_rows = def_rows if block_rows is None else block_rows
    dff_chunk = def_dff if dff_chunk is None else dff_chunk

    sub = _sublane_multiple(x.dtype)

    # Row tile: as large as allowed (HBM weight traffic ~ (N/bm) * (|W1|+|W2|)),
    # aligned to the dtype's sublane packing and (when big enough) the MXU tile.
    bm = min(block_rows, _round_up(n, sub))
    bm = max(sub, (bm // sub) * sub)
    if bm >= mxu_align:
        bm = (bm // mxu_align) * mxu_align

    # v7x: the "parallel" row axis is sharded over 2 TensorCores -> need >= 2 tiles.
    if gen == "v7x" and _round_up(n, bm) // bm < 2 and bm > sub:
        bm = max(sub, _round_up((n + 1) // 2, sub))
        if bm >= mxu_align:
            bm = (bm // mxu_align) * mxu_align

    # d_ff chunk: multiple of the MXU tile that divides d_ff (fallback: 128-aligned).
    bff = _pick_dff_chunk(d_ff, dff_chunk, mxu_align)
    if bff == d_ff and d_ff > dff_chunk:
        bff = _pick_dff_chunk(d_ff, dff_chunk, 128)

    # Per-generation VMEM budget (v7x: 64 MiB/TC, v5e/v6e: 128 MiB).
    budget = int(_vmem_capacity_bytes(gen) * 0.85)

    def isz(a):
        return jnp.dtype(a.dtype).itemsize

    def est(bm_, bff_):
        # Per-operand dtype sizes; weights single-buffered when fully resident.
        wbuf = 1 if bff_ == d_ff else 2
        e = 2 * bm_ * d_model * isz(x)                        # x tile (double-buffered)
        e += 2 * bm_ * d_model * isz(x)                       # out tile
        e += wbuf * (d_model * bff_ * isz(w1)                 # W1 chunk
                     + max(bff_, 128) * isz(b1)               # b1 chunk
                     + bff_ * d_model * isz(w2)               # W2 chunk
                     + max(d_model, 128) * isz(b2))           # b2
        if d_ff // bff_ > 1:
            e += bm_ * d_model * 4                            # f32 accumulator scratch
        return e

    # Shrink tiles (d_ff chunk first, then rows) until the estimate fits the budget.
    while est(bm, bff) > budget and bff % 256 == 0 and bff > 128:
        bff //= 2
    while est(bm, bff) > budget and bm > sub:
        bm = max(sub, (bm // 2 // sub) * sub)

    vmem_limit = int(min(budget, max(est(bm, bff) + 8 * _MIB, 32 * _MIB)))
    resident = bff == d_ff

    try:
        return _feed_forward_impl(x, w1, b1, w2, b2, bm=bm, bff=bff,
                                  vmem_limit=vmem_limit, resident_weights=resident)
    except Exception:
        if not resident:
            raise
        # Fallback for environments where Buffered(1) weight residency is unsupported.
        return _feed_forward_impl(x, w1, b1, w2, b2, bm=bm, bff=bff,
                                  vmem_limit=vmem_limit, resident_weights=False)


def init_params(key, d_model, d_ff, dtype=jnp.float32):
    """Deterministic PyTorch-Linear-style init: U(-1/sqrt(fan_in), 1/sqrt(fan_in))."""
    k1, k2, k3, k4 = jax.random.split(key, 4)
    bound1 = 1.0 / (d_model ** 0.5)
    bound2 = 1.0 / (d_ff ** 0.5)
    w1 = jax.random.uniform(k1, (d_model, d_ff), dtype, -bound1, bound1)
    b1 = jax.random.uniform(k2, (1, d_ff), dtype, -bound1, bound1)
    w2 = jax.random.uniform(k3, (d_ff, d_model), dtype, -bound2, bound2)
    b2 = jax.random.uniform(k4, (1, d_model), dtype, -bound2, bound2)
    return w1, b1, w2, b2


if __name__ == "__main__":
    key = jax.random.PRNGKey(0)
    batch, seq, d_model, d_ff = 2, 8, 32, 64

    kx, kp = jax.random.split(key)
    x = jax.random.normal(kx, (batch, seq, d_model), jnp.float32)
    w1, b1, w2, b2 = init_params(kp, d_model, d_ff)

    # Flatten (batch, seq) into rows for the kernel, reshape back after.
    x2d = x.reshape(batch * seq, d_model)
    out2d = feed_forward(x2d, w1, b1, w2, b2)
    out = out2d.reshape(batch, seq, d_model)
    jax.block_until_ready(out)

    # Cross-check against a pure-JAX reference (f32 path, single-chunk fused kernel).
    ref = jnp.maximum(x2d @ w1 + b1, 0.0) @ w2 + b2
    assert jnp.allclose(out2d, ref, atol=1e-5, rtol=1e-5), "f32 mismatch vs reference"

    # bf16 inputs/weights with f32 accumulation (the recommended path at real sizes).
    xb = x2d.astype(jnp.bfloat16)
    w1b, b1b, w2b, b2b = (a.astype(jnp.bfloat16) for a in (w1, b1, w2, b2))
    outb = feed_forward(xb, w1b, b1b, w2b, b2b)
    jax.block_until_ready(outb)
    assert jnp.allclose(outb.astype(jnp.float32), ref, atol=1e-1, rtol=1e-1), \
        "bf16 mismatch vs reference"

    # Row count not divisible by the tile (exercises the padding path).
    x_odd = x2d[:13]
    out_odd = feed_forward(x_odd, w1, b1, w2, b2)
    jax.block_until_ready(out_odd)
    ref_odd = jnp.maximum(x_odd @ w1 + b1, 0.0) @ w2 + b2
    assert jnp.allclose(out_odd, ref_odd, atol=1e-5, rtol=1e-5), "ragged-rows mismatch"

    # Larger d_ff with a forced small chunk (exercises the accumulator / k-streaming path).
    d_ff_big = 256
    w1c, b1c, w2c, b2c = init_params(kp, d_model, d_ff_big)
    out_chunked = feed_forward(x2d, w1c, b1c, w2c, b2c, dff_chunk=128)
    jax.block_until_ready(out_chunked)
    ref_chunked = jnp.maximum(x2d @ w1c + b1c, 0.0) @ w2c + b2c
    assert jnp.allclose(out_chunked, ref_chunked, atol=1e-5, rtol=1e-5), \
        "chunked d_ff mismatch vs reference"

    print("KERNEL_OK")
</pallas_src>

<mosaic_0001>
module attributes {stable_mosaic.version = 11 : i64} {
  func.func @_ffn_kernel_fused(%arg0: i32, %arg1: i32, %arg2: memref<16x32xf32, #tpu.memory_space<vmem>>, %arg3: memref<32x64xf32, #tpu.memory_space<vmem>>, %arg4: memref<1x64xf32, #tpu.memory_space<vmem>>, %arg5: memref<64x32xf32, #tpu.memory_space<vmem>>, %arg6: memref<1x32xf32, #tpu.memory_space<vmem>>, %arg7: memref<16x32xf32, #tpu.memory_space<vmem>>) attributes {dimension_semantics = [#tpu.dimension_semantics<parallel>, #tpu.dimension_semantics<arbitrary>], iteration_bounds = array<i64: 1, 1>, scalar_prefetch = 0 : i64, scratch_operands = 0 : i64, tpu.core_type = #tpu.core_type<tc>, window_params = [{transform_indices = @transform_0, window_bounds = array<i64: 16, 32>}, {pipeline_mode = #tpu.pipeline_mode<synchronous>, transform_indices = @transform_1, window_bounds = array<i64: 32, 64>}, {pipeline_mode = #tpu.pipeline_mode<synchronous>, transform_indices = @transform_2, window_bounds = array<i64: 1, 64>}, {pipeline_mode = #tpu.pipeline_mode<synchronous>, transform_indices = @transform_3, window_bounds = array<i64: 64, 32>}, {pipeline_mode = #tpu.pipeline_mode<synchronous>, transform_indices = @transform_4, window_bounds = array<i64: 1, 32>}, {transform_indices = @transform_5, window_bounds = array<i64: 16, 32>}]} {
    %c0 = arith.constant 0 : index
    %c0_0 = arith.constant 0 : index
    %0 = vector.load %arg2[%c0, %c0_0] : memref<16x32xf32, #tpu.memory_space<vmem>>, vector<16x32xf32>
    %c0_1 = arith.constant 0 : index
    %c0_2 = arith.constant 0 : index
    %1 = vector.load %arg3[%c0_1, %c0_2] : memref<32x64xf32, #tpu.memory_space<vmem>>, vector<32x64xf32>
    %cst = arith.constant dense<0.000000e+00> : vector<16x64xf32>
    %2 = tpu.matmul %0, %1, %cst {dimension_numbers = #tpu.dot_dimension_numbers<[1], [0], [0], [1], [0, 0, 1, 1], [], []>} : vector<16x32xf32>, vector<32x64xf32>, vector<16x64xf32> -> vector<16x64xf32>
    %c0_3 = arith.constant 0 : index
    %c0_4 = arith.constant 0 : index
    %3 = vector.load %arg4[%c0_3, %c0_4] : memref<1x64xf32, #tpu.memory_space<vmem>>, vector<1x64xf32>
    %4 = vector.broadcast %3 : vector<1x64xf32> to vector<16x64xf32>
    %5 = arith.addf %2, %4 : vector<16x64xf32>
    %cst_5 = arith.constant 0.000000e+00 : f32
    %6 = vector.broadcast %cst_5 : f32 to vector<16x64xf32>
    %7 = arith.maximumf %5, %6 : vector<16x64xf32>
    %c0_6 = arith.constant 0 : index
    %c0_7 = arith.constant 0 : index
    %8 = vector.load %arg5[%c0_6, %c0_7] : memref<64x32xf32, #tpu.memory_space<vmem>>, vector<64x32xf32>
    %cst_8 = arith.constant dense<0.000000e+00> : vector<16x32xf32>
    %9 = tpu.matmul %7, %8, %cst_8 {dimension_numbers = #tpu.dot_dimension_numbers<[1], [0], [0], [1], [0, 0, 1, 1], [], []>} : vector<16x64xf32>, vector<64x32xf32>, vector<16x32xf32> -> vector<16x32xf32>
    %c0_9 = arith.constant 0 : index
    %c0_10 = arith.constant 0 : index
    %10 = vector.load %arg6[%c0_9, %c0_10] : memref<1x32xf32, #tpu.memory_space<vmem>>, vector<1x32xf32>
    %11 = vector.broadcast %10 : vector<1x32xf32> to vector<16x32xf32>
    %12 = arith.addf %9, %11 : vector<16x32xf32>
    %c0_11 = arith.constant 0 : index
    %c0_12 = arith.constant 0 : index
    %13 = vector.load %arg7[%c0_11, %c0_12] : memref<16x32xf32, #tpu.memory_space<vmem>>, vector<16x32xf32>
    tpu.vector_store %arg7[%c0_11, %c0_12], %12 {strides = array<i32>} : memref<16x32xf32, #tpu.memory_space<vmem>>, vector<16x32xf32>,
    return
  }
  func.func @transform_0(%arg0: i32, %arg1: i32) -> (i32, i32) {
    %c0_i32 = arith.constant 0 : i32
    %c0_i32_0 = arith.constant 0 : i32
    return %arg0, %c0_i32 : i32, i32
  }
  func.func @transform_1(%arg0: i32, %arg1: i32) -> (i32, i32) {
    %c0_i32 = arith.constant 0 : i32
    %c0_i32_0 = arith.constant 0 : i32
    return %c0_i32, %arg1 : i32, i32
  }
  func.func @transform_2(%arg0: i32, %arg1: i32) -> (i32, i32) {
    %c0_i32 = arith.constant 0 : i32
    %c0_i32_0 = arith.constant 0 : i32
    return %c0_i32, %arg1 : i32, i32
  }
  func.func @transform_3(%arg0: i32, %arg1: i32) -> (i32, i32) {
    %c0_i32 = arith.constant 0 : i32
    %c0_i32_0 = arith.constant 0 : i32
    return %arg1, %c0_i32 : i32, i32
  }
  func.func @transform_4(%arg0: i32, %arg1: i32) -> (i32, i32) {
    %c0_i32 = arith.constant 0 : i32
    %c0_i32_0 = arith.constant 0 : i32
    %c0_i32_1 = arith.constant 0 : i32
    return %c0_i32, %c0_i32_0 : i32, i32
  }
  func.func @transform_5(%arg0: i32, %arg1: i32) -> (i32, i32) {
    %c0_i32 = arith.constant 0 : i32
    %c0_i32_0 = arith.constant 0 : i32
    return %arg0, %c0_i32 : i32, i32
  }
}

module attributes {stable_mosaic.version = 11 : i64} {
  func.func @_ffn_kernel_fused(%arg0: i32, %arg1: i32, %arg2: memref<16x32xf32, #tpu.memory_space<vmem>>, %arg3: memref<32x64xf32, #tpu.memory_space<vmem>>, %arg4: memref<1x64xf32, #tpu.memory_space<vmem>>, %arg5: memref<64x32xf32, #tpu.memory_space<vmem>>, %arg6: memref<1x32xf32, #tpu.memory_space<vmem>>, %arg7: memref<16x32xf32, #tpu.memory_space<vmem>>) attributes {dimension_semantics = [#tpu.dimension_semantics<parallel>, #tpu.dimension_semantics<arbitrary>], iteration_bounds = array<i64: 1, 1>, scalar_prefetch = 0 : i64, scratch_operands = 0 : i64, tpu.core_type = #tpu.core_type<tc>, window_params = [{transform_indices = @transform_0, window_bounds = array<i64: 16, 32>}, {transform_indices = @transform_1, window_bounds = array<i64: 32, 64>}, {transform_indices = @transform_2, window_bounds = array<i64: 1, 64>}, {transform_indices = @transform_3, window_bounds = array<i64: 64, 32>}, {pipeline_mode = #tpu.pipeline_mode<synchronous>, transform_indices = @transform_4, window_bounds = array<i64: 1, 32>}, {transform_indices = @transform_5, window_bounds = array<i64: 16, 32>}]} {
    %c0 = arith.constant 0 : index
    %c0_0 = arith.constant 0 : index
    %0 = vector.load %arg2[%c0, %c0_0] : memref<16x32xf32, #tpu.memory_space<vmem>>, vector<16x32xf32>
    %c0_1 = arith.constant 0 : index
    %c0_2 = arith.constant 0 : index
    %1 = vector.load %arg3[%c0_1, %c0_2] : memref<32x64xf32, #tpu.memory_space<vmem>>, vector<32x64xf32>
    %cst = arith.constant dense<0.000000e+00> : vector<16x64xf32>
    %2 = tpu.matmul %0, %1, %cst {dimension_numbers = #tpu.dot_dimension_numbers<[1], [0], [0], [1], [0, 0, 1, 1], [], []>} : vector<16x32xf32>, vector<32x64xf32>, vector<16x64xf32> -> vector<16x64xf32>
    %c0_3 = arith.constant 0 : index
    %c0_4 = arith.constant 0 : index
    %3 = vector.load %arg4[%c0_3, %c0_4] : memref<1x64xf32, #tpu.memory_space<vmem>>, vector<1x64xf32>
    %4 = vector.broadcast %3 : vector<1x64xf32> to vector<16x64xf32>
    %5 = arith.addf %2, %4 : vector<16x64xf32>
    %cst_5 = arith.constant 0.000000e+00 : f32
    %6 = vector.broadcast %cst_5 : f32 to vector<16x64xf32>
    %7 = arith.maximumf %5, %6 : vector<16x64xf32>
    %c0_6 = arith.constant 0 : index
    %c0_7 = arith.constant 0 : index
    %8 = vector.load %arg5[%c0_6, %c0_7] : memref<64x32xf32, #tpu.memory_space<vmem>>, vector<64x32xf32>
    %cst_8 = arith.constant dense<0.000000e+00> : vector<16x32xf32>
    %9 = tpu.matmul %7, %8, %cst_8 {dimension_numbers = #tpu.dot_dimension_numbers<[1], [0], [0], [1], [0, 0, 1, 1], [], []>} : vector<16x64xf32>, vector<64x32xf32>, vector<16x32xf32> -> vector<16x32xf32>
    %c0_9 = arith.constant 0 : index
    %c0_10 = arith.constant 0 : index
    %10 = vector.load %arg6[%c0_9, %c0_10] : memref<1x32xf32, #tpu.memory_space<vmem>>, vector<1x32xf32>
    %11 = vector.broadcast %10 : vector<1x32xf32> to vector<16x32xf32>
    %12 = arith.addf %9, %11 : vector<16x32xf32>
    %c0_11 = arith.constant 0 : index
    %c0_12 = arith.constant 0 : index
    %13 = vector.load %arg7[%c0_11, %c0_12] : memref<16x32xf32, #tpu.memory_space<vmem>>, vector<16x32xf32>
    tpu.vector_store %arg7[%c0_11, %c0_12], %12 {strides = array<i32>} : memref<16x32xf32, #tpu.memory_space<vmem>>, vector<16x32xf32>,
    return
  }
  func.func @transform_0(%arg0: i32, %arg1: i32) -> (i32, i32) {
    %c0_i32 = arith.constant 0 : i32
    %c0_i32_0 = arith.constant 0 : i32
    return %arg0, %c0_i32 : i32, i32
  }
  func.func @transform_1(%arg0: i32, %arg1: i32) -> (i32, i32) {
    %c0_i32 = arith.constant 0 : i32
    %c0_i32_0 = arith.constant 0 : i32
    return %c0_i32, %arg1 : i32, i32
  }
  func.func @transform_2(%arg0: i32, %arg1: i32) -> (i32, i32) {
    %c0_i32 = arith.constant 0 : i32
    %c0_i32_0 = arith.constant 0 : i32
    return %c0_i32, %arg1 : i32, i32
  }
  func.func @transform_3(%arg0: i32, %arg1: i32) -> (i32, i32) {
    %c0_i32 = arith.constant 0 : i32
    %c0_i32_0 = arith.constant 0 : i32
    return %arg1, %c0_i32 : i32, i32
  }
  func.func @transform_4(%arg0: i32, %arg1: i32) -> (i32, i32) {
    %c0_i32 = arith.constant 0 : i32
    %c0_i32_0 = arith.constant 0 : i32
    %c0_i32_1 = arith.constant 0 : i32
    return %c0_i32, %c0_i32_0 : i32, i32
  }
  func.func @transform_5(%arg0: i32, %arg1: i32) -> (i32, i32) {
    %c0_i32 = arith.constant 0 : i32
    %c0_i32_0 = arith.constant 0 : i32
    return %arg0, %c0_i32 : i32, i32
  }
}

</mosaic_0001>

<bundles_post_ra>
// kernel: _feed_forward_impl.1
= control target key start
LH: loop header
LB: loop body
LE: loop exit
PB: predicated region body
PF: predicated region fallthrough
CT: control target
= control target key end

     0   :  { %vm34_vm0 = vcmask 261120   ;;  %s398_s0 = inlined_call_operand.vmem [shape: f32[16,32], index: 0, kind: input, shape index: {}]   ;;  %s399_s1 = inlined_call_operand.vmem [shape: f32[32,64], index: 1, kind: input, shape index: {}]   ;;  %s400_s2 = inlined_call_operand.vmem [shape: f32[1,64], index: 2, kind: input, shape index: {}]   ;;  %s401_s3 = inlined_call_operand.vmem [shape: f32[64,32], index: 3, kind: input, shape index: {}]   ;;  %s402_s4 = inlined_call_operand.vmem [shape: f32[1,32], index: 4, kind: input, shape index: {}]   ;;  %s403_s5 = inlined_call_operand.hbm [shape: f32[16,32], index: 5, kind: output, shape index: {}]  }
   0x1   :  { %v26_v0 = vld [vmem:[%s399_s1 + $0x18] sm:$0xff]  ;;  %v25_v1 = vld [vmem:[%s399_s1 + $0x10] sm:$0xff]  ;;  %v21_v2 = vld [vmem:[%s398_s0] sm:$0xff] }
   0x2   :  { %255 = vmatprep.subr.mxu0 %v26_v0  ;;  %v24_v3 = vld [vmem:[%s399_s1 + $0x8] sm:$0xff]  ;;  %263 = vmatprep.mubr.msk.f32.mxu0 %vm34_vm0, %v21_v2  ;;  %v125_v4 = vld [vmem:[%s401_s3 + $0x38] sm:$0xff]  ;;  %v124_v5 = vld [vmem:[%s401_s3 + $0x30] sm:$0xff] }
   0x3   :  { %256 = vmatpush3.msra.mxu0 %v26_v0  ;;  %266 = vmatprep.subr.mxu1 %v125_v4 }
   0x4   :  { %257 = vmatprep.subr.mxu0 %v25_v1 }
   0x5   :  { %10 = vsyncpa [#allocation3], 0  ;;  %258 = vmatpush3.msra.mxu0 %v25_v1  ;;  %v23_v6 = vld [vmem:[%s399_s1] sm:$0xff]  ;;  %267 = vmatpush3.msra.mxu1 %v125_v4  ;;  %v123_v7 = vld [vmem:[%s401_s3 + $0x28] sm:$0xff]  ;;  %vm133_vm1 = vcmask 523264  }
   0x6   :  { %259 = vmatprep.subr.mxu0 %v24_v3  ;;  %268 = vmatprep.subr.mxu1 %v124_v5  ;;  %v22_v8 = vld [vmem:[%s398_s0 + $0x8] sm:$0xff]  ;;  %v122_v9 = vld [vmem:[%s401_s3 + $0x20] sm:$0xff]  ;;  %v121_v10 = vld [vmem:[%s401_s3 + $0x18] sm:$0xff] }
   0x7   :  { %260 = vmatpush3.msra.mxu0 %v24_v3  ;;  %269 = vmatpush3.msra.mxu1 %v124_v5  ;;  %v120_v11 = vld [vmem:[%s401_s3 + $0x10] sm:$0xff]  ;;  %v119_v12 = vld [vmem:[%s401_s3 + $0x8] sm:$0xff]  ;;  %v118_v13 = vld [vmem:[%s401_s3] sm:$0xff]  ;;  %s310_s3 = smov [#allocation2]  }
   0x8   :  { %261 = vmatprep.subr.mxu0 %v23_v6  ;;  %270 = vmatprep.subr.mxu1 %v123_v7  ;;  %v233_v14 = vld [vmem:[%s400_s2] ss:$0 sm:$0xff]  ;;  %s222_s23 = sshll.u32 %s310_s3, 4  ;;  %s223_s23 = int_to_ptr.vmem [resolvable:$true] %s222_s23 }
   0x9   :  { %262 = vmatpush3.msra.mxu0 %v23_v6  ;;  %271 = vmatpush3.msra.mxu1 %v123_v7  ;;  %v236_v21 = vld [vmem:[%s402_s4] ss:$0 sm:$0xff]  ;;  %s288_s2 = scalar_lea.vmem %s223_s23, 256  ;;  %p293_p1 = scmp.lt.s32.totalorder %s223_s23, %s223_s23 }
   0xa   :  { %264 = vmatmul.mubr.msk.f32.vlgmr.msra.gmra.mxu0 %vm34_vm0, %v22_v8  ;;  %272 = vmatprep.subr.mxu1 %v122_v9  ;;  %p289_p0 = scmp.ne.s32.totalorder %s223_s23, %s288_s2  ;;  %p294_p2 = scmp.lt.s32.totalorder %s288_s2, %s288_s2 }
   0xb   :  { %273 = vmatpush3.msra.mxu1 %v122_v9 }
   0xc   :  { %274 = vmatprep.subr.mxu1 %v121_v10  ;;  %p295_p3 = por %p294_p2, %p293_p1 }
   0xd   :  { %275 = vmatpush3.msra.mxu1 %v121_v10 }
   0xe   :  { %276 = vmatprep.subr.mxu1 %v120_v11  ;;  %p296_p4 = pnand %p295_p3, %p289_p0 }
   0xf   :  { %277 = vmatpush3.msra.mxu1 %v120_v11 }
  0x10   :  { %278 = vmatprep.subr.mxu1 %v119_v12 }
  0x11   :  { %279 = vmatpush3.msra.mxu1 %v119_v12 }
  0x12   :  { %280 = vmatprep.subr.mxu1 %v118_v13 }
  0x13   :  { %281 = vmatpush3.msra.mxu1 %v118_v13 }
  0xca   :  { %v265_v15 = vpop.f32.mrf.mxu0 }
  0xcb   :  { %v113_v16 = vadd.f32 %v265_v15, %v233_v14 }
  0xcc   :  { %v107_v17 = vpop.f32.mrf.mxu0 }
  0xcd   :  { %v108_v18 = vadd.f32 %v233_v14, %v107_v17  ;;  %v117_v20 = vmax.f32 %v113_v16, 0.0 }
  0xcf   :  { %v116_v19 = vmax.f32 %v108_v18, 0.0 }
  0xd1   :  { %282 = vmatprep.mubr.msk.f32.mxu1 %vm133_vm1, %v116_v19 }
  0xd2   :  { %283 = vmatmul.mubr.msk.f32.vlgmr.msra.gmra.mxu1 %vm133_vm1, %v117_v20 }
 0x192   :  { %v284_v22 = vpop.f32.mrf.mxu1 }
 0x193   :  { %v212_v23 = vadd.f32 %v284_v22, %v236_v21 }
 0x194   :  { %v206_v24 = vpop.f32.mrf.mxu1 }
 0x195   :  { %216 = vst.msk [vmem:[#allocation2 + $0x8] sm:$0xff] %vm34_vm0, %v212_v23  ;;  %v207_v25 = vadd.f32 %v236_v21, %v206_v24 }
 0x197   :  { %215 = vst.msk [vmem:[#allocation2] sm:$0xff] %vm34_vm0, %v207_v25 }
 0x198   :  { %299 = shalt.err (!%p296_p4)
}
 0x199   :  { %s311_s24 = smov 128   ;;  %s312_s4 = smov 8  }
 0x19a   :  { %228 = dma.vmem_to_hbm [thread:$0]  %s223_s23, 256, %s403_s5, [#allocation3], %s311_s24, %s311_s24, %s312_s4  }
 0x19b   :  { %308 = dma.done.wait [#allocation3], 256  }
 0x19c   :  { %309 = vsyncadd [#allocation3], 4294967040 }
 0x19d   :  { %232 = vsyncpa [#allocation3], 1 }

// kernel: _feed_forward_impl.1
= control target key start
LH: loop header
LB: loop body
LE: loop exit
PB: predicated region body
PF: predicated region fallthrough
CT: control target
= control target key end

     0   :  { %vm34_vm0 = vcmask 261120   ;;  %s398_s0 = inlined_call_operand.vmem [shape: f32[16,32], index: 0, kind: input, shape index: {}]   ;;  %s399_s1 = inlined_call_operand.vmem [shape: f32[32,64], index: 1, kind: input, shape index: {}]   ;;  %s400_s2 = inlined_call_operand.vmem [shape: f32[1,64], index: 2, kind: input, shape index: {}]   ;;  %s401_s3 = inlined_call_operand.vmem [shape: f32[64,32], index: 3, kind: input, shape index: {}]   ;;  %s402_s4 = inlined_call_operand.vmem [shape: f32[1,32], index: 4, kind: input, shape index: {}]   ;;  %s403_s5 = inlined_call_operand.hbm [shape: f32[16,32], index: 5, kind: output, shape index: {}]  }
   0x1   :  { %v26_v0 = vld [vmem:[%s399_s1 + $0x18] sm:$0xff]  ;;  %v25_v1 = vld [vmem:[%s399_s1 + $0x10] sm:$0xff]  ;;  %v21_v2 = vld [vmem:[%s398_s0] sm:$0xff] }
   0x2   :  { %255 = vmatprep.subr.mxu0 %v26_v0  ;;  %v24_v3 = vld [vmem:[%s399_s1 + $0x8] sm:$0xff]  ;;  %263 = vmatprep.mubr.msk.f32.mxu0 %vm34_vm0, %v21_v2  ;;  %v125_v4 = vld [vmem:[%s401_s3 + $0x38] sm:$0xff]  ;;  %v124_v5 = vld [vmem:[%s401_s3 + $0x30] sm:$0xff] }
   0x3   :  { %256 = vmatpush3.msra.mxu0 %v26_v0  ;;  %266 = vmatprep.subr.mxu1 %v125_v4 }
   0x4   :  { %257 = vmatprep.subr.mxu0 %v25_v1 }
   0x5   :  { %10 = vsyncpa [#allocation3], 0  ;;  %258 = vmatpush3.msra.mxu0 %v25_v1  ;;  %v23_v6 = vld [vmem:[%s399_s1] sm:$0xff]  ;;  %267 = vmatpush3.msra.mxu1 %v125_v4  ;;  %v123_v7 = vld [vmem:[%s401_s3 + $0x28] sm:$0xff]  ;;  %vm133_vm1 = vcmask 523264  }
   0x6   :  { %259 = vmatprep.subr.mxu0 %v24_v3  ;;  %268 = vmatprep.subr.mxu1 %v124_v5  ;;  %v22_v8 = vld [vmem:[%s398_s0 + $0x8] sm:$0xff]  ;;  %v122_v9 = vld [vmem:[%s401_s3 + $0x20] sm:$0xff]  ;;  %v121_v10 = vld [vmem:[%s401_s3 + $0x18] sm:$0xff] }
   0x7   :  { %260 = vmatpush3.msra.mxu0 %v24_v3  ;;  %269 = vmatpush3.msra.mxu1 %v124_v5  ;;  %v120_v11 = vld [vmem:[%s401_s3 + $0x10] sm:$0xff]  ;;  %v119_v12 = vld [vmem:[%s401_s3 + $0x8] sm:$0xff]  ;;  %v118_v13 = vld [vmem:[%s401_s3] sm:$0xff]  ;;  %s310_s3 = smov [#allocation2]  }
   0x8   :  { %261 = vmatprep.subr.mxu0 %v23_v6  ;;  %270 = vmatprep.subr.mxu1 %v123_v7  ;;  %v233_v14 = vld [vmem:[%s400_s2] ss:$0 sm:$0xff]  ;;  %s222_s23 = sshll.u32 %s310_s3, 4  ;;  %s223_s23 = int_to_ptr.vmem [resolvable:$true] %s222_s23 }
   0x9   :  { %262 = vmatpush3.msra.mxu0 %v23_v6  ;;  %271 = vmatpush3.msra.mxu1 %v123_v7  ;;  %v236_v21 = vld [vmem:[%s402_s4] ss:$0 sm:$0xff]  ;;  %s288_s2 = scalar_lea.vmem %s223_s23, 256  ;;  %p293_p1 = scmp.lt.s32.totalorder %s223_s23, %s223_s23 }
   0xa   :  { %264 = vmatmul.mubr.msk.f32.vlgmr.msra.gmra.mxu0 %vm34_vm0, %v22_v8  ;;  %272 = vmatprep.subr.mxu1 %v122_v9  ;;  %p289_p0 = scmp.ne.s32.totalorder %s223_s23, %s288_s2  ;;  %p294_p2 = scmp.lt.s32.totalorder %s288_s2, %s288_s2 }
   0xb   :  { %273 = vmatpush3.msra.mxu1 %v122_v9 }
   0xc   :  { %274 = vmatprep.subr.mxu1 %v121_v10  ;;  %p295_p3 = por %p294_p2, %p293_p1 }
   0xd   :  { %275 = vmatpush3.msra.mxu1 %v121_v10 }
   0xe   :  { %276 = vmatprep.subr.mxu1 %v120_v11  ;;  %p296_p4 = pnand %p295_p3, %p289_p0 }
   0xf   :  { %277 = vmatpush3.msra.mxu1 %v120_v11 }
  0x10   :  { %278 = vmatprep.subr.mxu1 %v119_v12 }
  0x11   :  { %279 = vmatpush3.msra.mxu1 %v119_v12 }
  0x12   :  { %280 = vmatprep.subr.mxu1 %v118_v13 }
  0x13   :  { %281 = vmatpush3.msra.mxu1 %v118_v13 }
  0xca   :  { %v265_v15 = vpop.f32.mrf.mxu0 }
  0xcb   :  { %v113_v16 = vadd.f32 %v265_v15, %v233_v14 }
  0xcc   :  { %v107_v17 = vpop.f32.mrf.mxu0 }
  0xcd   :  { %v108_v18 = vadd.f32 %v233_v14, %v107_v17  ;;  %v117_v20 = vmax.f32 %v113_v16, 0.0 }
  0xcf   :  { %v116_v19 = vmax.f32 %v108_v18, 0.0 }
  0xd1   :  { %282 = vmatprep.mubr.msk.f32.mxu1 %vm133_vm1, %v116_v19 }
  0xd2   :  { %283 = vmatmul.mubr.msk.f32.vlgmr.msra.gmra.mxu1 %vm133_vm1, %v117_v20 }
 0x192   :  { %v284_v22 = vpop.f32.mrf.mxu1 }
 0x193   :  { %v212_v23 = vadd.f32 %v284_v22, %v236_v21 }
 0x194   :  { %v206_v24 = vpop.f32.mrf.mxu1 }
 0x195   :  { %216 = vst.msk [vmem:[#allocation2 + $0x8] sm:$0xff] %vm34_vm0, %v212_v23  ;;  %v207_v25 = vadd.f32 %v236_v21, %v206_v24 }
 0x197   :  { %215 = vst.msk [vmem:[#allocation2] sm:$0xff] %vm34_vm0, %v207_v25 }
 0x198   :  { %299 = shalt.err (!%p296_p4)
}
 0x199   :  { %s311_s24 = smov 128   ;;  %s312_s4 = smov 8  }
 0x19a   :  { %228 = dma.vmem_to_hbm [thread:$0]  %s223_s23, 256, %s403_s5, [#allocation3], %s311_s24, %s311_s24, %s312_s4  }
 0x19b   :  { %308 = dma.done.wait [#allocation3], 256  }
 0x19c   :  { %309 = vsyncadd [#allocation3], 4294967040 }
 0x19d   :  { %232 = vsyncpa [#allocation3], 1 }

</bundles_post_ra>
